<compile_context>
chip_gen: v7x
topology: tpu7x:2x2x1
jax: 0.10.0
libtpu: 0.0.40
codegen_flags: <defaults>
</compile_context>

<pallas_src>
import jax
import jax.numpy as jnp
from jax.experimental import pallas as pl
from jax.experimental.pallas import tpu as pltpu

HIDDEN = 64          # per-network hidden width fixed by the module
BLOCK_B = 8          # batch rows per grid step (sublane-aligned)


def _split_model_kernel(obs_ref, w1_ref, b1_ref, w2_ref, b2_ref, w3_ref, b3_ref,
                        out_ref):
    # obs_ref: (BB, D)   w1: (D, 128)   w2: (128, 128)   w3: (128, A+1)
    x = obs_ref[...]
    h = jnp.tanh(jnp.dot(x, w1_ref[...], preferred_element_type=jnp.float32)
                 + b1_ref[...])                                   # (BB, 128)
    h = jnp.tanh(jnp.dot(h, w2_ref[...], preferred_element_type=jnp.float32)
                 + b2_ref[...])                                   # (BB, 128)
    out_ref[...] = (jnp.dot(h, w3_ref[...], preferred_element_type=jnp.float32)
                    + b3_ref[...])                                # (BB, A+1)


def split_model_forward(obs, p, *, block_b=BLOCK_B):
    """Returns (logits, value) for SplitModel.

    `obs` is (B, D) float32; `p` holds the six Linear layers' weights/biases
    with PyTorch Linear semantics already transposed to (in, out).
    """
    obs = obs.astype(jnp.float32)
    B, D = obs.shape
    A = p["wa3"].shape[1]
    H2 = 2 * HIDDEN

    # ---- fuse actor + critic into one block-diagonal MLP (host-side) ----
    w1 = jnp.concatenate([p["wa1"], p["wc1"]], axis=1)                    # (D, 128)
    b1 = jnp.concatenate([p["ba1"], p["bc1"]], axis=0).reshape(1, H2)
    w2 = jnp.zeros((H2, H2), jnp.float32)
    w2 = w2.at[:HIDDEN, :HIDDEN].set(p["wa2"]).at[HIDDEN:, HIDDEN:].set(p["wc2"])
    b2 = jnp.concatenate([p["ba2"], p["bc2"]], axis=0).reshape(1, H2)
    w3 = jnp.zeros((H2, A + 1), jnp.float32)
    w3 = w3.at[:HIDDEN, :A].set(p["wa3"]).at[HIDDEN:, A:].set(p["wc3"])
    b3 = jnp.concatenate([p["ba3"], p["bc3"]], axis=0).reshape(1, A + 1)

    # ---- pad batch to a multiple of the batch block ----
    Bp = ((B + block_b - 1) // block_b) * block_b
    if Bp != B:
        obs = jnp.pad(obs, ((0, Bp - B), (0, 0)))
    n_blocks = Bp // block_b

    def full_spec(a):
        nd = a.ndim
        return pl.BlockSpec(a.shape, lambda i, _n=nd: (0,) * _n)

    in_specs = [pl.BlockSpec((block_b, D), lambda i: (i, 0))] + [
        full_spec(a) for a in (w1, b1, w2, b2, w3, b3)
    ]
    out_specs = pl.BlockSpec((block_b, A + 1), lambda i: (i, 0))

    fused = pl.pallas_call(
        _split_model_kernel,
        out_shape=jax.ShapeDtypeStruct((Bp, A + 1), jnp.float32),
        grid_spec=pltpu.PrefetchScalarGridSpec(
            num_scalar_prefetch=0,
            grid=(n_blocks,),
            in_specs=in_specs,
            out_specs=out_specs),
        compiler_params=pltpu.CompilerParams(
            dimension_semantics=("parallel",)),      # batch rows independent -> v7x megacore
    )(obs, w1, b1, w2, b2, w3, b3)

    fused = fused[:B]
    logits = fused[:, :A]
    value = fused[:, A:A + 1]
    # TODO(synk): torch.distributions.Categorical is a host-side wrapper; the
    # kernel returns the logits that parameterize it (plus the critic value).
    return logits, value


def forward_reference(obs, p):
    """Pure-JAX reference mirroring the PyTorch forward (for validation)."""
    ha = jnp.tanh(obs @ p["wa1"] + p["ba1"])
    ha = jnp.tanh(ha @ p["wa2"] + p["ba2"])
    logits = ha @ p["wa3"] + p["ba3"]
    hc = jnp.tanh(obs @ p["wc1"] + p["bc1"])
    hc = jnp.tanh(hc @ p["wc2"] + p["bc2"])
    value = hc @ p["wc3"] + p["bc3"]
    return logits, value


if __name__ == "__main__":
    B, D, A = 16, 32, 6      # batch, obs_space_shape, action_space_shape

    ks = iter(jax.random.split(jax.random.PRNGKey(0), 16))

    def init(shape, scale=0.1):
        return scale * jax.random.normal(next(ks), shape, jnp.float32)

    params = dict(
        wa1=init((D, HIDDEN)),      ba1=init((HIDDEN,), 0.05),
        wa2=init((HIDDEN, HIDDEN)), ba2=init((HIDDEN,), 0.05),
        wa3=init((HIDDEN, A), 0.01), ba3=init((A,), 0.0),
        wc1=init((D, HIDDEN)),      bc1=init((HIDDEN,), 0.05),
        wc2=init((HIDDEN, HIDDEN)), bc2=init((HIDDEN,), 0.05),
        wc3=init((HIDDEN, 1), 1.0),  bc3=init((1,), 0.0),
    )

    obs = jax.random.normal(next(ks), (B, D), jnp.float32)

    logits, value = split_model_forward(obs, params)
    jax.block_until_ready((logits, value))

    ref_logits, ref_value = forward_reference(obs, params)
    dl = float(jnp.max(jnp.abs(logits - ref_logits)))
    dv = float(jnp.max(jnp.abs(value - ref_value)))
    if dl > 1e-4 or dv > 1e-4:
        raise AssertionError(f"mismatch vs reference: logits {dl}, value {dv}")

    print("KERNEL_OK")
</pallas_src>

<mosaic_0001>
module attributes {stable_mosaic.version = 11 : i64} {
  func.func @_split_model_kernel(%arg0: i32, %arg1: memref<8x32xf32, #tpu.memory_space<vmem>>, %arg2: memref<32x128xf32, #tpu.memory_space<vmem>>, %arg3: memref<1x128xf32, #tpu.memory_space<vmem>>, %arg4: memref<128x128xf32, #tpu.memory_space<vmem>>, %arg5: memref<1x128xf32, #tpu.memory_space<vmem>>, %arg6: memref<128x7xf32, #tpu.memory_space<vmem>>, %arg7: memref<1x7xf32, #tpu.memory_space<vmem>>, %arg8: memref<8x7xf32, #tpu.memory_space<vmem>>) attributes {dimension_semantics = [#tpu.dimension_semantics<parallel>], iteration_bounds = array<i64: 2>, scalar_prefetch = 0 : i64, scratch_operands = 0 : i64, tpu.core_type = #tpu.core_type<tc>, window_params = [{transform_indices = @transform_0, window_bounds = array<i64: 8, 32>}, {pipeline_mode = #tpu.pipeline_mode<synchronous>, transform_indices = @transform_1, window_bounds = array<i64: 32, 128>}, {pipeline_mode = #tpu.pipeline_mode<synchronous>, transform_indices = @transform_2, window_bounds = array<i64: 1, 128>}, {pipeline_mode = #tpu.pipeline_mode<synchronous>, transform_indices = @transform_3, window_bounds = array<i64: 128, 128>}, {pipeline_mode = #tpu.pipeline_mode<synchronous>, transform_indices = @transform_4, window_bounds = array<i64: 1, 128>}, {pipeline_mode = #tpu.pipeline_mode<synchronous>, transform_indices = @transform_5, window_bounds = array<i64: 128, 7>}, {pipeline_mode = #tpu.pipeline_mode<synchronous>, transform_indices = @transform_6, window_bounds = array<i64: 1, 7>}, {transform_indices = @transform_7, window_bounds = array<i64: 8, 7>}]} {
    %c0 = arith.constant 0 : index
    %c0_0 = arith.constant 0 : index
    %0 = vector.load %arg1[%c0, %c0_0] : memref<8x32xf32, #tpu.memory_space<vmem>>, vector<8x32xf32>
    %c0_1 = arith.constant 0 : index
    %c0_2 = arith.constant 0 : index
    %1 = vector.load %arg2[%c0_1, %c0_2] : memref<32x128xf32, #tpu.memory_space<vmem>>, vector<32x128xf32>
    %cst = arith.constant dense<0.000000e+00> : vector<8x128xf32>
    %2 = tpu.matmul %0, %1, %cst {dimension_numbers = #tpu.dot_dimension_numbers<[1], [0], [0], [1], [0, 0, 1, 1], [], []>} : vector<8x32xf32>, vector<32x128xf32>, vector<8x128xf32> -> vector<8x128xf32>
    %c0_3 = arith.constant 0 : index
    %c0_4 = arith.constant 0 : index
    %3 = vector.load %arg3[%c0_3, %c0_4] : memref<1x128xf32, #tpu.memory_space<vmem>>, vector<1x128xf32>
    %4 = vector.broadcast %3 : vector<1x128xf32> to vector<8x128xf32>
    %5 = arith.addf %2, %4 : vector<8x128xf32>
    %6 = math.tanh %5 : vector<8x128xf32>
    %c0_5 = arith.constant 0 : index
    %c0_6 = arith.constant 0 : index
    %7 = vector.load %arg4[%c0_5, %c0_6] : memref<128x128xf32, #tpu.memory_space<vmem>>, vector<128x128xf32>
    %cst_7 = arith.constant dense<0.000000e+00> : vector<8x128xf32>
    %8 = tpu.matmul %6, %7, %cst_7 {dimension_numbers = #tpu.dot_dimension_numbers<[1], [0], [0], [1], [0, 0, 1, 1], [], []>} : vector<8x128xf32>, vector<128x128xf32>, vector<8x128xf32> -> vector<8x128xf32>
    %c0_8 = arith.constant 0 : index
    %c0_9 = arith.constant 0 : index
    %9 = vector.load %arg5[%c0_8, %c0_9] : memref<1x128xf32, #tpu.memory_space<vmem>>, vector<1x128xf32>
    %10 = vector.broadcast %9 : vector<1x128xf32> to vector<8x128xf32>
    %11 = arith.addf %8, %10 : vector<8x128xf32>
    %12 = math.tanh %11 : vector<8x128xf32>
    %c0_10 = arith.constant 0 : index
    %c0_11 = arith.constant 0 : index
    %13 = vector.load %arg6[%c0_10, %c0_11] : memref<128x7xf32, #tpu.memory_space<vmem>>, vector<128x7xf32>
    %cst_12 = arith.constant dense<0.000000e+00> : vector<8x7xf32>
    %14 = tpu.matmul %12, %13, %cst_12 {dimension_numbers = #tpu.dot_dimension_numbers<[1], [0], [0], [1], [0, 0, 1, 1], [], []>} : vector<8x128xf32>, vector<128x7xf32>, vector<8x7xf32> -> vector<8x7xf32>
    %c0_13 = arith.constant 0 : index
    %c0_14 = arith.constant 0 : index
    %15 = vector.load %arg7[%c0_13, %c0_14] : memref<1x7xf32, #tpu.memory_space<vmem>>, vector<1x7xf32>
    %16 = vector.broadcast %15 : vector<1x7xf32> to vector<8x7xf32>
    %17 = arith.addf %14, %16 : vector<8x7xf32>
    %c0_15 = arith.constant 0 : index
    %c0_16 = arith.constant 0 : index
    %18 = vector.load %arg8[%c0_15, %c0_16] : memref<8x7xf32, #tpu.memory_space<vmem>>, vector<8x7xf32>
    tpu.vector_store %arg8[%c0_15, %c0_16], %17 {strides = array<i32>} : memref<8x7xf32, #tpu.memory_space<vmem>>, vector<8x7xf32>,
    return
  }
  func.func @transform_0(%arg0: i32) -> (i32, i32) {
    %c0_i32 = arith.constant 0 : i32
    %c0_i32_0 = arith.constant 0 : i32
    return %arg0, %c0_i32 : i32, i32
  }
  func.func @transform_1(%arg0: i32) -> (i32, i32) {
    %c0_i32 = arith.constant 0 : i32
    %c0_i32_0 = arith.constant 0 : i32
    %c0_i32_1 = arith.constant 0 : i32
    return %c0_i32, %c0_i32_0 : i32, i32
  }
  func.func @transform_2(%arg0: i32) -> (i32, i32) {
    %c0_i32 = arith.constant 0 : i32
    %c0_i32_0 = arith.constant 0 : i32
    %c0_i32_1 = arith.constant 0 : i32
    return %c0_i32, %c0_i32_0 : i32, i32
  }
  func.func @transform_3(%arg0: i32) -> (i32, i32) {
    %c0_i32 = arith.constant 0 : i32
    %c0_i32_0 = arith.constant 0 : i32
    %c0_i32_1 = arith.constant 0 : i32
    return %c0_i32, %c0_i32_0 : i32, i32
  }
  func.func @transform_4(%arg0: i32) -> (i32, i32) {
    %c0_i32 = arith.constant 0 : i32
    %c0_i32_0 = arith.constant 0 : i32
    %c0_i32_1 = arith.constant 0 : i32
    return %c0_i32, %c0_i32_0 : i32, i32
  }
  func.func @transform_5(%arg0: i32) -> (i32, i32) {
    %c0_i32 = arith.constant 0 : i32
    %c0_i32_0 = arith.constant 0 : i32
    %c0_i32_1 = arith.constant 0 : i32
    return %c0_i32, %c0_i32_0 : i32, i32
  }
  func.func @transform_6(%arg0: i32) -> (i32, i32) {
    %c0_i32 = arith.constant 0 : i32
    %c0_i32_0 = arith.constant 0 : i32
    %c0_i32_1 = arith.constant 0 : i32
    return %c0_i32, %c0_i32_0 : i32, i32
  }
  func.func @transform_7(%arg0: i32) -> (i32, i32) {
    %c0_i32 = arith.constant 0 : i32
    %c0_i32_0 = arith.constant 0 : i32
    return %arg0, %c0_i32 : i32, i32
  }
}

</mosaic_0001>

<bundles_post_ra>
// kernel: tpu_custom_call.1
= control target key start
LH: loop header
LB: loop body
LE: loop exit
PB: predicated region body
PF: predicated region fallthrough
CT: control target
= control target key end

     0   :  { %12 = vsyncpa [#allocation3], 0  ;;  %s933_s24 = smov 0   ;;  %s1122_s0 = inlined_call_operand.vmem [shape: f32[16,32], index: 0, kind: input, shape index: {}]   ;;  %s1123_s1 = inlined_call_operand.hbm [shape: f32[32,128], index: 1, kind: input, shape index: {}]   ;;  %s1124_s2 = inlined_call_operand.vmem [shape: f32[1,128], index: 2, kind: input, shape index: {}]   ;;  %s1125_s3 = inlined_call_operand.vmem [shape: f32[128,128], index: 3, kind: input, shape index: {}]   ;;  %s1126_s4 = inlined_call_operand.vmem [shape: f32[1,128], index: 4, kind: input, shape index: {}]   ;;  %s1127_s5 = inlined_call_operand.vmem [shape: f32[128,7], index: 5, kind: input, shape index: {}]   ;;  %s1128_s6 = inlined_call_operand.vmem [shape: f32[1,7], index: 6, kind: input, shape index: {}]   ;;  %s1129_s7 = inlined_call_operand.vmem [shape: f32[16,7], index: 7, kind: output, shape index: {}]  }
   0x1 LB: > { %s939_s25 = sadd.s32 4294967295, %s885_s24   ;;  %p632_p0 = scmp.ge.s32.totalorder %s885_s24, 1  ;;  %s885_s24 = sphi %s933_s24, %s18_s24  }
   0x2   : > { %p201_p1 = scmp.lt.s32.totalorder %s885_s24, 3  ;;  %s887_s26 = smov [#allocation2]  }
   0x3   : > { %s213_s27 = sshll.u32 %s887_s26, 4  ;;  %p1130_p3 = scmp.eq.s32.totalorder %s939_s25, 0  ;;  %s214_s27 = int_to_ptr.vmem [resolvable:$true] %s213_s27 }
   0x4   : > { %p943_p2 = pnand %p632_p0, %p201_p1  ;;  %s847_s9 = scalar_lea.hbm %s1123_s1, 512 }
   0x5   : > { %p848_p6 = scmp.ne.s32.totalorder %s1123_s1, %s847_s9  ;;  %p854_p10 = scmp.lt.u32.totalorder %s847_s9, %s1123_s1 }
   0x6   : > { %s1132_s28 = scalar_select %p943_p2, 1, 0 }
   0x7   : > { %p823_p4 = pneg %p943_p2 }
   0x9   : > { %p952_p5 = pnand %p1130_p3, %p823_p4 }
   0xb   : > { %p849_p7 = pneg %p952_p5 }
   0xd   : > { %p850_p8 = pnand %p849_p7, %p848_p6 }
   0xf   : > { %p851_p9 = pneg %p850_p8 }
  0x11   : > { %p856_p11 = pnand %p854_p10, %p851_p9 }
  0x13   : > { %859 = shalt.err (!%p856_p11)
}
  0x14   : > { %s860_s14 = scalar_lea.vmem %s214_s27, 512  ;;  %p868_p1 = scmp.lt.s32.totalorder %s214_s27, %s214_s27 }
  0x15   : > { %p861_p12 = scmp.ne.s32.totalorder %s214_s27, %s860_s14  ;;  %p869_p4 = scmp.lt.s32.totalorder %s860_s14, %s860_s14 }
  0x17   : > { %p863_p13 = pnand %p861_p12, %p849_p7  ;;  %p870_p3 = por %p869_p4, %p868_p1 }
  0x19   : > { %p864_p0 = pneg %p863_p13 }
  0x1b   : > { %p871_p2 = pnand %p870_p3, %p864_p0 }
  0x1d   : > { %874 = shalt.err (!%p871_p2)
}
  0x1e   : > { %s888_s15 = smov 128   ;;  %s889_s16 = smov 8  }
  0x1f   : > { %826 = dma.hbm_to_vmem [thread:$0]  (!%p952_p5), %s1123_s1, 512, %s214_s27, [#allocation3], %s888_s15, %s888_s15, %s889_s16  }
  0x20   : > { %p1134_p6 = scmp.ne.s32.totalorder %s1132_s28, 0 }
  0x21   : > { %p1135_p8 = scmp.eq.s32.totalorder (!%p1134_p6), %s939_s25, 0 }
  0x22   : > { %251 = sbr.rel (%p1134_p6) target bundleno = 717 (0x2cd), region = 48 }
  0x29   : > { %880 = dma.done.wait (%p1135_p8), [#allocation3], 512   ;;  %p1136_p7 = pmov %p1135_p8 }
  0x2a   : > { %p281_p2 = scmp.lt.s32.totalorder %s939_s25, 1  ;;  %v890_v0 = vmov 0.0|0.0   ;;  %vm891_vm0 = vmmov 0   ;;  %v892_v1 = vmov 0.0   ;;  %v290_v2 = vld [vmem:[#allocation2] sm:$0xff]  ;;  %v291_v3 = vld [vmem:[#allocation2 + $0x8] sm:$0xff] }
  0x2b   : > { %882 = vsyncadd (%p1136_p7), [#allocation3], 4294966784  ;;  %765 = vmatprep.subr.bf16.mxu0 %v890_v0  ;;  %692 = vmatprep.mubr.msk.f32.mxu0 %vm891_vm0, %v892_v1  ;;  %v292_v4 = vld [vmem:[#allocation2 + $0x10] sm:$0xff]  ;;  %v766_v5 = vpack.c.bf16 %v291_v3, %v290_v2  ;;  %v293_v6 = vld [vmem:[#allocation2 + $0x18] sm:$0xff]  ;;  %vm301_vm1 = vcmask 261120   ;;  %vm563_vm2 = vcmask 56320  }
  0x2c   : > { %771 = vmatprep.subr.bf16.mxu1 %v890_v0  ;;  %727 = vmatprep.mubr.msk.f32.mxu1 %vm891_vm0, %v892_v1  ;;  %s1138_s25 = smov (!%p281_p2, %s939_s25), 1  ;;  %v376_v7 = vld [vmem:[%s1125_s3] sm:$0xff]  ;;  %v377_v8 = vld [vmem:[%s1125_s3 + $0x8] sm:$0xff]  ;;  %v378_v9 = vld [vmem:[%s1125_s3 + $0x10] sm:$0xff]  ;;  %v769_v11 = vpack.c.bf16 %v293_v6, %v292_v4 }
  0x2d   : > { %s637_s19 = sshll.u32 %s1138_s25, 3  ;;  %v379_v10 = vld [vmem:[%s1125_s3 + $0x18] sm:$0xff]  ;;  %767 = vmatpush3.bf16.msra.mxu0 %v766_v5  ;;  %v772_v12 = vpack.c.bf16 %v377_v8, %v376_v7  ;;  %v380_v14 = vld [vmem:[%s1125_s3 + $0x20] sm:$0xff]  ;;  %v381_v15 = vld [vmem:[%s1125_s3 + $0x28] sm:$0xff] }
  0x2e   : > { %768 = vmatprep.subr.bf16.mxu0 %v890_v0  ;;  %s284_s9 = scalar_lea.vmem %s1122_s0, %s637_s19  ;;  %v775_v13 = vpack.c.bf16 %v379_v10, %v378_v9  ;;  %v778_v17 = vpack.c.bf16 %v381_v15, %v380_v14  ;;  %v382_v18 = vld [vmem:[%s1125_s3 + $0x30] sm:$0xff]  ;;  %v383_v19 = vld [vmem:[%s1125_s3 + $0x38] sm:$0xff]  ;;  %v384_v21 = vld [vmem:[%s1125_s3 + $0x40] sm:$0xff]  ;;  %s288_s14 = scalar_lea.vmem %s1129_s7, %s637_s19 }
  0x2f   : > { %773 = vmatpush3.bf16.msra.mxu1 %v772_v12  ;;  %v289_v16 = vld [vmem:[%s284_s9] sm:$0xff]  ;;  %v781_v20 = vpack.c.bf16 %v383_v19, %v382_v18  ;;  %v385_v22 = vld [vmem:[%s1125_s3 + $0x48] sm:$0xff]  ;;  %v386_v24 = vld [vmem:[%s1125_s3 + $0x50] sm:$0xff] }
  0x30   : > { %774 = vmatprep.subr.bf16.mxu1 %v890_v0  ;;  %v784_v23 = vpack.c.bf16 %v385_v22, %v384_v21  ;;  %v387_v25 = vld [vmem:[%s1125_s3 + $0x58] sm:$0xff]  ;;  %v388_v27 = vld [vmem:[%s1125_s3 + $0x60] sm:$0xff]  ;;  %v389_v28 = vld [vmem:[%s1125_s3 + $0x68] sm:$0xff] }
  0x31   : > { %770 = vmatpush3.bf16.msra.mxu0 %v769_v11  ;;  %v787_v26 = vpack.c.bf16 %v387_v25, %v386_v24  ;;  %v790_v29 = vpack.c.bf16 %v389_v28, %v388_v27  ;;  %v390_v30 = vld [vmem:[%s1125_s3 + $0x70] sm:$0xff]  ;;  %v391_v31 = vld [vmem:[%s1125_s3 + $0x78] sm:$0xff]  ;;  %v470_v33 = vld [vmem:[%s1127_s5] sm:$0xff] }
  0x32   : > { %795 = vmatprep.subr.bf16.mxu0 %v890_v0  ;;  %v793_v32 = vpack.c.bf16 %v391_v31, %v390_v30  ;;  %v471_v34 = vld [vmem:[%s1127_s5 + $0x8] sm:$0xff]  ;;  %v472_v35 = vld [vmem:[%s1127_s5 + $0x10] sm:$0xff]  ;;  %v473_v37 = vld [vmem:[%s1127_s5 + $0x18] sm:$0xff] }
  0x33   : > { %776 = vmatpush3.bf16.msra.mxu1 %v775_v13  ;;  %v796_v36 = vpack.c.bf16 %v471_v34, %v470_v33  ;;  %v799_v38 = vpack.c.bf16 %v473_v37, %v472_v35  ;;  %v474_v39 = vld [vmem:[%s1127_s5 + $0x20] sm:$0xff]  ;;  %v475_v40 = vld [vmem:[%s1127_s5 + $0x28] sm:$0xff]  ;;  %v476_v42 = vld [vmem:[%s1127_s5 + $0x30] sm:$0xff] }
  0x34   : > { %693 = vmatmul.mubr.msk.f32.vlgmr.msra.gmra.mrb[0].mxu0 %vm301_vm1, %v289_v16  ;;  %777 = vmatprep.subr.bf16.mxu1 %v890_v0  ;;  %v802_v41 = vpack.c.bf16 %v475_v40, %v474_v39  ;;  %v477_v43 = vld [vmem:[%s1127_s5 + $0x38] sm:$0xff]  ;;  %v478_v45 = vld [vmem:[%s1127_s5 + $0x40] sm:$0xff]  ;;  %v479_v46 = vld [vmem:[%s1127_s5 + $0x48] sm:$0xff] }
  0x35   : > { %762 = vmatprep.mubr.msk.f32.mxu0 %vm891_vm0, %v892_v1  ;;  %797 = vmatpush3.bf16.msra.mxu0 %v796_v36  ;;  %v805_v44 = vpack.c.bf16 %v477_v43, %v476_v42  ;;  %v808_v47 = vpack.c.bf16 %v479_v46, %v478_v45  ;;  %v639_v48 = vld [vmem:[%s1124_s2] ss:$0 sm:$0xff]  ;;  %v480_v53 = vld [vmem:[%s1127_s5 + $0x50] sm:$0xff]  ;;  %v481_v54 = vld [vmem:[%s1127_s5 + $0x58] sm:$0xff] }
  0x36   : > { %798 = vmatprep.subr.bf16.mxu0 %v890_v0  ;;  %v811_v55 = vpack.c.bf16 %v481_v54, %v480_v53  ;;  %v482_v56 = vld [vmem:[%s1127_s5 + $0x60] sm:$0xff]  ;;  %v483_v57 = vld [vmem:[%s1127_s5 + $0x68] sm:$0xff]  ;;  %v484_v59 = vld [vmem:[%s1127_s5 + $0x70] sm:$0xff] }
  0x37   : > { %779 = vmatpush3.bf16.msra.mxu1 %v778_v17  ;;  %v814_v58 = vpack.c.bf16 %v483_v57, %v482_v56  ;;  %v485_v60 = vld [vmem:[%s1127_s5 + $0x78] sm:$0xff]  ;;  %v641_v62 = vld [vmem:[%s1126_s4] ss:$0 sm:$0xff] }
  0x38   : > { %780 = vmatprep.subr.bf16.mxu1 %v890_v0  ;;  %v817_v61 = vpack.c.bf16 %v485_v60, %v484_v59  ;;  %v642_v4 = vld [vmem:[%s1128_s6] ss:$0 sm:$0xff] }
  0x39   : > { %800 = vmatpush3.bf16.msra.mxu0 %v799_v38 }
  0x3a   : > { %801 = vmatprep.subr.bf16.mxu0 %v890_v0 }
  0x3b   : > { %782 = vmatpush3.bf16.msra.mxu1 %v781_v20 }
  0x3c   : > { %783 = vmatprep.subr.bf16.mxu1 %v890_v0 }
  0x3d   : > { %803 = vmatpush3.bf16.msra.mxu0 %v802_v41 }
  0x3e   : > { %804 = vmatprep.subr.bf16.mxu0 %v890_v0 }
  0x3f   : > { %785 = vmatpush3.bf16.msra.mxu1 %v784_v23 }
  0x40   : > { %786 = vmatprep.subr.bf16.mxu1 %v890_v0 }
  0x41   : > { %806 = vmatpush3.bf16.msra.mxu0 %v805_v44 }
  0x42   : > { %807 = vmatprep.subr.bf16.mxu0 %v890_v0 }
  0x43   : > { %788 = vmatpush3.bf16.msra.mxu1 %v787_v26 }
  0x44   : > { %789 = vmatprep.subr.bf16.mxu1 %v890_v0 }
  0x45   : > { %809 = vmatpush3.bf16.msra.mxu0 %v808_v47 }
  0x46   : > { %810 = vmatprep.subr.bf16.mxu0 %v890_v0 }
  0x47   : > { %791 = vmatpush3.bf16.msra.mxu1 %v790_v29 }
  0x48   : > { %792 = vmatprep.subr.bf16.mxu1 %v890_v0 }
  0x49   : > { %812 = vmatpush3.bf16.msra.mxu0 %v811_v55 }
  0x4a   : > { %813 = vmatprep.subr.bf16.mxu0 %v890_v0 }
  0x4b   : > { %794 = vmatpush3.bf16.msra.mxu1 %v793_v32 }
  0x4d   : > { %815 = vmatpush3.bf16.msra.mxu0 %v814_v58 }
  0x4e   : > { %816 = vmatprep.subr.bf16.mxu0 %v890_v0 }
  0x51   : > { %818 = vmatpush3.bf16.msra.mxu0 %v817_v61 }
 0x107   : > { %v371_v49 = vpop.f32.mrb[0].mxu0 }
 0x108   : > { %v372_v50 = vadd.f32 %v639_v48, %v371_v49  ;;  %v694_v51 = vpop.f32.mrb[1].mxu0 }
 0x10a   : > { %843 = vtanh.f32 %v372_v50 }
 0x114   : > { %v844_v52 = vpop.eup %843 }
 0x115   : > { %728 = vmatmul.mubr.f32.vlgmr.msra.gmra.mrb[0].mxu1 %v844_v52 }
 0x1e8   : > { %v465_v63 = vpop.f32.mrb[0].mxu1 }
 0x1e9   : > { %v466_v1 = vadd.f32 %v641_v62, %v465_v63  ;;  %v729_v2 = vpop.f32.mrb[1].mxu1 }
 0x1eb   : > { %845 = vtanh.f32 %v466_v1 }
 0x1f5   : > { %v846_v3 = vpop.eup %845 }
 0x1f6   : > { %763 = vmatmul.mubr.f32.vlgmr.msra.gmra.mrb[2].mxu0 %v846_v3 }
 0x2c9   : > { %v559_v0 = vpop.f32.mrb[2].mxu0 }
 0x2ca   : > { %v560_v5 = vadd.f32 %v642_v4, %v559_v0  ;;  %v764_v6 = vpop.f32.mrb[3].mxu0 }
 0x2cc   : > { %564 = vst.msk [vmem:[%s288_s14] sm:$0xff] %vm563_vm2, %v560_v5 }
 0x2cd PF: > { %s18_s24 = sadd.s32 1, %s885_s24  }
 0x2ce   : > { %p15_p3 = scmp.ge.s32.totalorder %s18_s24, 4  }
 0x2d0   :  { %17 = sbr.rel (!%p15_p3) target bundleno = 1 (0x1), region = 83 }
 0x2d7   :  { %584 = vsyncpa [#allocation3], 1 }
 0x2d8   :  { %586 = vsyncpa [#allocation3 + $0x1], 1 }

</bundles_post_ra>
